<compile_context>
chip_gen: v5e
topology: v5e:2x2
jax: 0.10.0
libtpu: 0.0.40
codegen_flags: <defaults>
</compile_context>

<pallas_src>
import functools

import jax
import jax.numpy as jnp
from jax.experimental import pallas as pl
from jax.experimental.pallas import tpu as pltpu


def _round_up(x, m):
    return ((x + m - 1) // m) * m


def _pixel_ce_kernel(logits_ref, labels_ref, loss_ref, cnt_ref, sum_ref, *,
                     ignore_index, loss_th, hw):
    # logits_ref: (1, C, TP)  f32/bf16   -- classes on sublanes, pixels on lanes
    # labels_ref: (1, 1, TP)  i32
    # loss_ref  : (1, 1, TP)  f32        -- lane-dense per-pixel loss
    # cnt_ref   : (1, 1, 1, 128) f32     -- per-tile partial count(loss > th)
    # sum_ref   : (1, 1, 1, 128) f32     -- per-tile partial masked sum
    logits = logits_ref[0].astype(jnp.float32)        # (C, TP)
    labels = labels_ref[0]                            # (1, TP)
    C, TP = logits.shape

    # numerically-stable log-sum-exp over the class (sublane) axis
    m = jnp.max(logits, axis=0, keepdims=True)                           # (1, TP)
    lse = m + jnp.log(jnp.sum(jnp.exp(logits - m), axis=0, keepdims=True))

    # gather the label-class logit via one-hot select + sublane reduction
    # NOTE: labels outside [0, C) that are not ignore_index silently yield
    # sel == 0 (loss == logsumexp) instead of raising, unlike PyTorch.
    cls = jax.lax.broadcasted_iota(jnp.int32, (C, TP), 0)
    sel = jnp.sum(jnp.where(cls == labels, logits, 0.0), axis=0, keepdims=True)

    loss = lse - sel                                                     # (1, TP)

    # ignore_index pixels contribute 0 loss (torch reduction='none' semantics);
    # lanes past the true pixel count (tail padding) are zeroed and excluded
    # from the bootstrap statistics.
    lane = jax.lax.broadcasted_iota(jnp.int32, (1, TP), 1)
    pix = pl.program_id(1) * TP + lane
    valid = pix < hw
    keep = jnp.logical_and(valid, labels != ignore_index)
    loss = jnp.where(keep, loss, 0.0)
    loss_ref[0] = loss

    # fused branch-A partial reductions for this tile
    above = jnp.logical_and(valid, loss > loss_th)
    cnt = jnp.sum(above.astype(jnp.float32))
    msum = jnp.sum(jnp.where(above, loss, 0.0))
    cnt_ref[...] = jnp.full(cnt_ref.shape, cnt, jnp.float32)
    sum_ref[...] = jnp.full(sum_ref.shape, msum, jnp.float32)


def pixel_cross_entropy(logits_nchw, labels_nhw, *, ignore_index, loss_th,
                        tile_p=4096):
    """Returns (per_pixel_loss[N*H*W], count(loss > th), masked_sum)."""
    N, C, H, W = logits_nchw.shape
    HW = H * W

    # Free views of the native layouts -- no HBM relayout before the kernel.
    logits_ncp = logits_nchw.reshape(N, C, HW)
    labels_np = labels_nhw.reshape(N, 1, HW).astype(jnp.int32)

    # Lane-dense pixel tiles; clamp for small inputs, keep a multiple of 128.
    tile_p = max(128, min(tile_p, _round_up(HW, 128)))
    num_tiles = pl.cdiv(HW, tile_p)

    kernel = functools.partial(
        _pixel_ce_kernel, ignore_index=ignore_index, loss_th=loss_th, hw=HW)

    loss, cnt_part, sum_part = pl.pallas_call(
        kernel,
        out_shape=(
            jax.ShapeDtypeStruct((N, 1, HW), jnp.float32),
            jax.ShapeDtypeStruct((N, num_tiles, 1, 128), jnp.float32),
            jax.ShapeDtypeStruct((N, num_tiles, 1, 128), jnp.float32),
        ),
        grid_spec=pltpu.PrefetchScalarGridSpec(
            num_scalar_prefetch=0,
            grid=(N, num_tiles),
            in_specs=[
                pl.BlockSpec((1, C, tile_p), lambda n, p: (n, 0, p)),
                pl.BlockSpec((1, 1, tile_p), lambda n, p: (n, 0, p)),
            ],
            out_specs=[
                pl.BlockSpec((1, 1, tile_p), lambda n, p: (n, 0, p)),
                pl.BlockSpec((1, 1, 1, 128), lambda n, p: (n, p, 0, 0)),
                pl.BlockSpec((1, 1, 1, 128), lambda n, p: (n, p, 0, 0)),
            ],
        ),
        compiler_params=pltpu.CompilerParams(
            dimension_semantics=("parallel", "parallel")),
    )(logits_ncp, labels_np)

    count = jnp.sum(cnt_part[:, :, 0, 0]).astype(jnp.int32)
    masked_sum = jnp.sum(sum_part[:, :, 0, 0])
    return loss.reshape(-1), count, masked_sum


def bootstrapped_ce(logits, labels, *, min_K, loss_th, ignore_index,
                    tile_p=4096):
    """Forward pass of BootstrappedCE(min_K, loss_th, ignore_index)."""
    pixel_losses, count, masked_sum = pixel_cross_entropy(
        logits, labels, ignore_index=ignore_index, loss_th=loss_th,
        tile_p=tile_p)

    # branch A: mean over losses above threshold (reductions fused in-kernel)
    masked_mean = masked_sum / jnp.maximum(count, 1).astype(jnp.float32)

    # branch B: mean of top-K losses -- only runs when count <= min_K.
    # TODO(synk): top_k runs in plain JAX (no single-kernel Pallas TPU top-k here).
    return jax.lax.cond(
        count > min_K,
        lambda _: masked_mean,
        lambda losses: jnp.mean(jax.lax.top_k(losses, min_K)[0]),
        pixel_losses,
    )


def _reference(logits, labels, *, min_K, loss_th, ignore_index):
    # pure-JAX reference of the same semantics, for a sanity check
    N, C, H, W = logits.shape
    lg = jnp.transpose(logits, (0, 2, 3, 1)).reshape(-1, C).astype(jnp.float32)
    lb = labels.reshape(-1).astype(jnp.int32)
    logp = jax.nn.log_softmax(lg, axis=-1)
    losses = -jnp.take_along_axis(logp, lb[:, None], axis=-1)[:, 0]
    losses = jnp.where(lb == ignore_index, 0.0, losses)
    mask = losses > loss_th
    count = jnp.sum(mask.astype(jnp.int32))
    masked_mean = jnp.sum(jnp.where(mask, losses, 0.0)) / jnp.maximum(count, 1)
    topk_mean = jnp.mean(jax.lax.top_k(losses, min_K)[0])
    return jnp.where(count > min_K, masked_mean, topk_mean)


if __name__ == "__main__":
    # module hyper-parameters (deterministic, no learned weights in this module)
    MIN_K = 16
    LOSS_TH = 0.3
    IGNORE_INDEX = 255

    key = jax.random.PRNGKey(0)
    k1, k2, k3 = jax.random.split(key, 3)

    N, C, H, W = 2, 4, 16, 16
    logits = jax.random.normal(k1, (N, C, H, W), dtype=jnp.float32)
    labels = jax.random.randint(k2, (N, H, W), 0, C, dtype=jnp.int32)
    # sprinkle a few ignore_index pixels
    ignore_mask = jax.random.uniform(k3, (N, H, W)) < 0.05
    labels = jnp.where(ignore_mask, IGNORE_INDEX, labels)

    out = jax.jit(
        functools.partial(
            bootstrapped_ce, min_K=MIN_K, loss_th=LOSS_TH,
            ignore_index=IGNORE_INDEX
        )
    )(logits, labels)
    out = jax.block_until_ready(out)

    ref = _reference(
        logits, labels, min_K=MIN_K, loss_th=LOSS_TH, ignore_index=IGNORE_INDEX
    )
    assert jnp.allclose(out, ref, atol=1e-4, rtol=1e-4), (out, ref)

    print("KERNEL_OK")
</pallas_src>

<mosaic_0001>
module attributes {stable_mosaic.version = 11 : i64} {
  func.func @_pixel_ce_kernel(%arg0: i32, %arg1: i32, %arg2: memref<1x4x256xf32, #tpu.memory_space<vmem>>, %arg3: memref<1x1x256xi32, #tpu.memory_space<vmem>>, %arg4: memref<1x1x256xf32, #tpu.memory_space<vmem>>, %arg5: memref<1x1x1x128xf32, #tpu.memory_space<vmem>>, %arg6: memref<1x1x1x128xf32, #tpu.memory_space<vmem>>) attributes {dimension_semantics = [#tpu.dimension_semantics<parallel>, #tpu.dimension_semantics<parallel>], iteration_bounds = array<i64: 2, 1>, scalar_prefetch = 0 : i64, scratch_operands = 0 : i64, tpu.core_type = #tpu.core_type<tc>, window_params = [{transform_indices = @transform_0, window_bounds = array<i64: 1, 4, 256>}, {transform_indices = @transform_1, window_bounds = array<i64: 1, 1, 256>}, {transform_indices = @transform_2, window_bounds = array<i64: 1, 1, 256>}, {transform_indices = @transform_3, window_bounds = array<i64: 1, 1, 1, 128>}, {transform_indices = @transform_4, window_bounds = array<i64: 1, 1, 1, 128>}]} {
    %c0 = arith.constant 0 : index
    %c0_0 = arith.constant 0 : index
    %c0_1 = arith.constant 0 : index
    %0 = vector.load %arg2[%c0, %c0_0, %c0_1] : memref<1x4x256xf32, #tpu.memory_space<vmem>>, vector<1x4x256xf32>
    %1 = vector.shape_cast %0 : vector<1x4x256xf32> to vector<4x256xf32>
    %c0_2 = arith.constant 0 : index
    %c0_3 = arith.constant 0 : index
    %c0_4 = arith.constant 0 : index
    %2 = vector.load %arg3[%c0_2, %c0_3, %c0_4] : memref<1x1x256xi32, #tpu.memory_space<vmem>>, vector<1x1x256xi32>
    %3 = vector.shape_cast %2 : vector<1x1x256xi32> to vector<1x256xi32>
    %cst = arith.constant dense<0xFF800000> : vector<256xf32>
    %4 = vector.multi_reduction <maximumf>, %1, %cst [0] : vector<4x256xf32> to vector<256xf32>
    %5 = vector.shape_cast %4 : vector<256xf32> to vector<1x256xf32>
    %6 = vector.broadcast %5 : vector<1x256xf32> to vector<4x256xf32>
    %7 = arith.subf %1, %6 : vector<4x256xf32>
    %8 = math.exp %7 : vector<4x256xf32>
    %cst_5 = arith.constant dense<0.000000e+00> : vector<256xf32>
    %9 = vector.multi_reduction <add>, %8, %cst_5 [0] : vector<4x256xf32> to vector<256xf32>
    %10 = vector.shape_cast %9 : vector<256xf32> to vector<1x256xf32>
    %11 = math.log %10 : vector<1x256xf32>
    %12 = arith.addf %5, %11 : vector<1x256xf32>
    %13 = tpu.iota {dimensions = array<i32: 0>} : vector<4x256xi32>
    %14 = vector.broadcast %3 : vector<1x256xi32> to vector<4x256xi32>
    %15 = arith.cmpi eq, %13, %14 : vector<4x256xi32>
    %cst_6 = arith.constant 0.000000e+00 : f32
    %16 = vector.broadcast %cst_6 : f32 to vector<4x256xf32>
    %17 = arith.select %15, %1, %16 : vector<4x256xi1>, vector<4x256xf32>
    %cst_7 = arith.constant dense<0.000000e+00> : vector<256xf32>
    %18 = vector.multi_reduction <add>, %17, %cst_7 [0] : vector<4x256xf32> to vector<256xf32>
    %19 = vector.shape_cast %18 : vector<256xf32> to vector<1x256xf32>
    %20 = arith.subf %12, %19 : vector<1x256xf32>
    %21 = tpu.iota {dimensions = array<i32: 1>} : vector<1x256xi32>
    %c256_i32 = arith.constant 256 : i32
    %22 = arith.muli %arg1, %c256_i32 : i32
    %23 = vector.broadcast %22 : i32 to vector<1x256xi32>
    %24 = arith.addi %23, %21 : vector<1x256xi32>
    %c256_i32_8 = arith.constant 256 : i32
    %25 = vector.broadcast %c256_i32_8 : i32 to vector<1x256xi32>
    %26 = arith.cmpi slt, %24, %25 : vector<1x256xi32>
    %c255_i32 = arith.constant 255 : i32
    %27 = vector.broadcast %c255_i32 : i32 to vector<1x256xi32>
    %28 = arith.cmpi ne, %3, %27 : vector<1x256xi32>
    %29 = arith.andi %26, %28 : vector<1x256xi1>
    %cst_9 = arith.constant 0.000000e+00 : f32
    %30 = vector.broadcast %cst_9 : f32 to vector<1x256xf32>
    %31 = arith.select %29, %20, %30 : vector<1x256xi1>, vector<1x256xf32>
    %c0_10 = arith.constant 0 : index
    %c0_11 = arith.constant 0 : index
    %c0_12 = arith.constant 0 : index
    %32 = vector.load %arg4[%c0_10, %c0_11, %c0_12] : memref<1x1x256xf32, #tpu.memory_space<vmem>>, vector<1x1x256xf32>
    %33 = vector.shape_cast %32 : vector<1x1x256xf32> to vector<1x256xf32>
    %34 = vector.shape_cast %31 : vector<1x256xf32> to vector<1x1x256xf32>
    tpu.vector_store %arg4[%c0_10, %c0_11, %c0_12], %34 {strides = array<i32>} : memref<1x1x256xf32, #tpu.memory_space<vmem>>, vector<1x1x256xf32>,
    %cst_13 = arith.constant 3.000000e-01 : f32
    %35 = vector.broadcast %cst_13 : f32 to vector<1x256xf32>
    %36 = arith.cmpf ogt, %31, %35 : vector<1x256xf32>
    %37 = arith.andi %26, %36 : vector<1x256xi1>
    %38 = arith.extui %37 : vector<1x256xi1> to vector<1x256xi32>
    %39 = arith.sitofp %38 : vector<1x256xi32> to vector<1x256xf32>
    %40 = vector.shape_cast %39 : vector<1x256xf32> to vector<1x1x256xf32>
    %cst_14 = arith.constant dense<0.000000e+00> : vector<1xf32>
    %41 = vector.multi_reduction <add>, %40, %cst_14 [1, 2] : vector<1x1x256xf32> to vector<1xf32>
    %42 = vector.shape_cast %41 : vector<1xf32> to vector<1x1x1xf32>
    %43 = vector.extract %42[0, 0, 0] : f32 from vector<1x1x1xf32>
    %cst_15 = arith.constant 0.000000e+00 : f32
    %44 = vector.broadcast %cst_15 : f32 to vector<1x256xf32>
    %45 = arith.select %37, %31, %44 : vector<1x256xi1>, vector<1x256xf32>
    %46 = vector.shape_cast %45 : vector<1x256xf32> to vector<1x1x256xf32>
    %cst_16 = arith.constant dense<0.000000e+00> : vector<1xf32>
    %47 = vector.multi_reduction <add>, %46, %cst_16 [1, 2] : vector<1x1x256xf32> to vector<1xf32>
    %48 = vector.shape_cast %47 : vector<1xf32> to vector<1x1x1xf32>
    %49 = vector.extract %48[0, 0, 0] : f32 from vector<1x1x1xf32>
    %50 = vector.broadcast %43 : f32 to vector<1x1x1x128xf32>
    %c0_17 = arith.constant 0 : index
    %c0_18 = arith.constant 0 : index
    %c0_19 = arith.constant 0 : index
    %c0_20 = arith.constant 0 : index
    %51 = vector.load %arg5[%c0_17, %c0_18, %c0_19, %c0_20] : memref<1x1x1x128xf32, #tpu.memory_space<vmem>>, vector<1x1x1x128xf32>
    tpu.vector_store %arg5[%c0_17, %c0_18, %c0_19, %c0_20], %50 {strides = array<i32>} : memref<1x1x1x128xf32, #tpu.memory_space<vmem>>, vector<1x1x1x128xf32>,
    %52 = vector.broadcast %49 : f32 to vector<1x1x1x128xf32>
    %c0_21 = arith.constant 0 : index
    %c0_22 = arith.constant 0 : index
    %c0_23 = arith.constant 0 : index
    %c0_24 = arith.constant 0 : index
    %53 = vector.load %arg6[%c0_21, %c0_22, %c0_23, %c0_24] : memref<1x1x1x128xf32, #tpu.memory_space<vmem>>, vector<1x1x1x128xf32>
    tpu.vector_store %arg6[%c0_21, %c0_22, %c0_23, %c0_24], %52 {strides = array<i32>} : memref<1x1x1x128xf32, #tpu.memory_space<vmem>>, vector<1x1x1x128xf32>,
    return
  }
  func.func @transform_0(%arg0: i32, %arg1: i32) -> (i32, i32, i32) {
    %c0_i32 = arith.constant 0 : i32
    %c0_i32_0 = arith.constant 0 : i32
    return %arg0, %c0_i32, %arg1 : i32, i32, i32
  }
  func.func @transform_1(%arg0: i32, %arg1: i32) -> (i32, i32, i32) {
    %c0_i32 = arith.constant 0 : i32
    %c0_i32_0 = arith.constant 0 : i32
    return %arg0, %c0_i32, %arg1 : i32, i32, i32
  }
  func.func @transform_2(%arg0: i32, %arg1: i32) -> (i32, i32, i32) {
    %c0_i32 = arith.constant 0 : i32
    %c0_i32_0 = arith.constant 0 : i32
    return %arg0, %c0_i32, %arg1 : i32, i32, i32
  }
  func.func @transform_3(%arg0: i32, %arg1: i32) -> (i32, i32, i32, i32) {
    %c0_i32 = arith.constant 0 : i32
    %c0_i32_0 = arith.constant 0 : i32
    %c0_i32_1 = arith.constant 0 : i32
    return %arg0, %arg1, %c0_i32, %c0_i32_0 : i32, i32, i32, i32
  }
  func.func @transform_4(%arg0: i32, %arg1: i32) -> (i32, i32, i32, i32) {
    %c0_i32 = arith.constant 0 : i32
    %c0_i32_0 = arith.constant 0 : i32
    %c0_i32_1 = arith.constant 0 : i32
    return %arg0, %arg1, %c0_i32, %c0_i32_0 : i32, i32, i32, i32
  }
}

</mosaic_0001>

<bundles_post_ra>
// kernel: bootstrapped_ce.1
= control target key start
LH: loop header
LB: loop body
LE: loop exit
PB: predicated region body
PF: predicated region fallthrough
CT: control target
= control target key end

     0   :  { %s722_s15 = smov 0   ;;  %s724_s16 = smov 0   ;;  %s796_s0 = inlined_call_operand.vmem [shape: f32[2,4,256], index: 0, kind: input, shape index: {}]   ;;  %s797_s1 = inlined_call_operand.vmem [shape: s32[2,1,256], index: 1, kind: input, shape index: {}]   ;;  %s798_s2 = inlined_call_operand.vmem [shape: f32[2,1,256], index: 2, kind: output, shape index: {0}]   ;;  %s799_s3 = inlined_call_operand.vmem [shape: f32[2,1,1,128], index: 3, kind: output, shape index: {1}]   ;;  %s800_s4 = inlined_call_operand.vmem [shape: f32[2,1,1,128], index: 4, kind: output, shape index: {2}]  }
   0x1   :  { %s726_s17 = smov 0  }
   0x2 LB: > { %s27_s18 = sadd.s32 1, %s689_s16  ;;  %p625_p0 = scmp.ge.s32.totalorder %s693_s17, 1  ;;  %s693_s17 = sphi %s726_s17, %s15_s17   ;;  %s689_s16 = sphi %s724_s16, %s802_s16   ;;  %s685_s15 = sphi %s722_s15, %s801_s15  }
   0x3   : > { %p29_p1 = scmp.ge.s32.totalorder %s27_s18, 2  ;;  %p208_p2 = scmp.lt.s32.totalorder %s693_s17, 3 }
   0x5   : > { %s804_s18 = smov (%p29_p1, %s27_s18), 0  ;;  %p209_p3 = pnand %p625_p0, %p208_p2 }
   0x6   : > { %p262_p4 = scmp.lt.s32.totalorder (!%p209_p3), %s685_s15, 1 }
   0x7   : > { %212 = sbr.rel (%p209_p3) target bundleno = 280 (0x118), region = 28 }
   0xc   : > { %s806_s15 = smov (!%p262_p4, %s685_s15), 1  ;;  %vm309_vm0 = vcmask 1043456   ;;  %v358_v22 = vlaneseq  ;;  %v695_v57 = vmov 0   ;;  %vm409_vm6 = vcmask 1040384  }
   0xd   : > { %s634_s19 = sshll.u32 %s806_s15, 3  ;;  %s628_s23 = sshll.u32 %s806_s15, 1 }
   0xe   : > { %s269_s22 = scalar_lea.vmem %s796_s0, %s634_s19  ;;  %s278_s26 = scalar_lea.vmem %s797_s1, %s628_s23  ;;  %v359_v28 = vshrl.u32 %v358_v22, 7  ;;  %vm414_vm8 = vcmp.lt.s32.totalorder %v358_v22, 256 }
   0xf   : > { %v301_v0 = vld [vmem:[%s269_s22] sm:$0xff]  ;;  %s287_s29 = scalar_lea.vmem %s798_s2, %s628_s23  ;;  %s294_s6 = scalar_lea.vmem %s799_s3, %s806_s15 }
  0x10   : > { %304 = vst [vmem:[#allocation1] ss:$2 sm:$0xff] %v301_v0  ;;  %v302_v23 = vld [vmem:[%s278_s26] sm:$0x3]  ;;  %s300_s10 = scalar_lea.vmem %s800_s4, %s806_s15 }
  0x11   : > { %v360_v31 = vperm.slane %v302_v23, 0  ;;  %v361_v32 = vperm.slane %v302_v23, 1  ;;  %vm396_vm3 = vcmp.ne.s32.totalorder %v302_v23, 255 }
  0x12   : > { %v397_v58 = vsel %vm396_vm3, 1, %v695_v57 }
  0x13   : > { %vm362_vm1 = vcmp.eq.s32.totalorder %v359_v28, %v360_v31  ;;  %vm363_vm2 = vcmp.eq.s32.totalorder %v359_v28, %v361_v32  ;;  %v398_v62 = vperm.slane %v397_v58, 0 }
  0x15   : > { %vm400_vm4 = vcmp.ne.s32.totalorder %v398_v62, 0 }
  0x17   : > { %v305_v1 = vld.sshfl [vmem:[#allocation1] sm:$0xff pattern:$0x75316420]  ;;  %v306_v2 = vld.sshfl [vmem:[#allocation1 + $0x8] sm:$0xff pattern:$0x75316420] }
  0x18   : > { %v310_v3 = vsel %vm309_vm0, %v305_v1, -inf  ;;  %v317_v4 = vsel %vm309_vm0, %v306_v2, -inf  ;;  %v399_v2 = vperm.slane %v397_v58, 1 }
  0x19   : > { %v311_v5 = vrot.slane %v310_v3, 4  ;;  %v318_v6 = vrot.slane %v317_v4, 4 }
  0x1a   : > { %vm401_vm5 = vcmp.ne.s32.totalorder %v399_v2, 0 }
  0x1b   : > { %v312_v7 = vmax.f32 %v310_v3, %v311_v5  ;;  %v319_v8 = vmax.f32 %v317_v4, %v318_v6 }
  0x1d   : > { %v313_v9 = vrot.slane %v312_v7, 2  ;;  %v320_v10 = vrot.slane %v319_v8, 2 }
  0x1f   : > { %v314_v11 = vmax.f32 %v312_v7, %v313_v9  ;;  %v321_v12 = vmax.f32 %v319_v8, %v320_v10 }
  0x21   : > { %v315_v13 = vrot.slane %v314_v11, 1  ;;  %v322_v14 = vrot.slane %v321_v12, 1 }
  0x23   : > { %v748_v15 = vmax.f32 %v314_v11, %v315_v13  ;;  %v750_v16 = vmax.f32 %v321_v12, %v322_v14  ;;  %v696_v12 = vmov 0.0  }
  0x25   : > { %v326_v17 = vrot.slane %v750_v16, 4 }
  0x27   : > { %v327_v18 = vsel %vm309_vm0, %v748_v15, %v326_v17 }
  0x28   : > { %v329_v19 = vsub.f32 %v301_v0, %v327_v18 }
  0x2a   : > { %v330_v20 = vmul.f32 1.442695, %v329_v19 }
  0x2c   : > { %665 = vpow2.f32 %v330_v20 }
  0x32   : > { %v666_v21 = vpop.eup %665 }
  0x33   : > { %333 = vst [vmem:[#allocation1] ss:$2 sm:$0xff] %v666_v21 }
  0x3a   : > { %v334_v24 = vld.sshfl [vmem:[#allocation1] sm:$0xff pattern:$0x75316420]  ;;  %v335_v25 = vld.sshfl [vmem:[#allocation1 + $0x8] sm:$0xff pattern:$0x75316420] }
  0x3b   : > { %v338_v26 = vsel %vm309_vm0, %v334_v24, 0.0  ;;  %v345_v27 = vsel %vm309_vm0, %v335_v25, 0.0  ;;  %364 = vst [vmem:[#allocation1] ss:$2 sm:$0xff] %v301_v0 }
  0x3c   : > { %v339_v29 = vrot.slane %v338_v26, 4  ;;  %v346_v30 = vrot.slane %v345_v27, 4 }
  0x3e   : > { %v340_v33 = vadd.f32 %v339_v29, %v338_v26  ;;  %v347_v34 = vadd.f32 %v346_v30, %v345_v27 }
  0x40   : > { %v341_v35 = vrot.slane %v340_v33, 2  ;;  %v348_v36 = vrot.slane %v347_v34, 2 }
  0x42   : > { %v342_v37 = vadd.f32 %v341_v35, %v340_v33  ;;  %v349_v38 = vadd.f32 %v348_v36, %v347_v34  ;;  %v365_v39 = vld.sshfl [vmem:[#allocation1] sm:$0xff pattern:$0x75316420]  ;;  %v366_v40 = vld.sshfl [vmem:[#allocation1 + $0x8] sm:$0xff pattern:$0x75316420] }
  0x43   : > { %v369_v41 = vsel %vm362_vm1, %v365_v39, 0.0  ;;  %v370_v42 = vsel %vm363_vm2, %v366_v40, 0.0 }
  0x44   : > { %v343_v43 = vrot.slane %v342_v37, 1  ;;  %v350_v44 = vrot.slane %v349_v38, 1  ;;  %v371_v45 = vsel %vm309_vm0, %v369_v41, 0.0  ;;  %v378_v46 = vsel %vm309_vm0, %v370_v42, 0.0 }
  0x45   : > { %v372_v47 = vrot.slane %v371_v45, 4  ;;  %v379_v48 = vrot.slane %v378_v46, 4 }
  0x46   : > { %v344_v49 = vadd.f32 %v343_v43, %v342_v37  ;;  %v351_v50 = vadd.f32 %v350_v44, %v349_v38 }
  0x47   : > { %v373_v51 = vadd.f32 %v372_v47, %v371_v45  ;;  %v380_v52 = vadd.f32 %v379_v48, %v378_v46 }
  0x48   : > { %667 = vlog2.f32 %v344_v49 }
  0x49   : > { %669 = vlog2.f32 %v351_v50  ;;  %v374_v53 = vrot.slane %v373_v51, 2  ;;  %v381_v54 = vrot.slane %v380_v52, 2 }
  0x4b   : > { %v375_v55 = vadd.f32 %v374_v53, %v373_v51  ;;  %v382_v56 = vadd.f32 %v381_v54, %v380_v52 }
  0x4d   : > { %v376_v59 = vrot.slane %v375_v55, 1  ;;  %v383_v60 = vrot.slane %v382_v56, 1 }
  0x4e   : > { %v668_v61 = vpop.eup %667 }
  0x4f   : > { %v670_v63 = vpop.eup %669  ;;  %v353_v0 = vmul.f32 0.6931472, %v668_v61  ;;  %v377_v1 = vadd.f32 %v376_v59, %v375_v55  ;;  %v384_v4 = vadd.f32 %v383_v60, %v382_v56 }
  0x50   : > { %v355_v3 = vmul.f32 0.6931472, %v670_v63 }
  0x51   : > { %v356_v5 = vadd.f32 %v353_v0, %v748_v15 }
  0x52   : > { %v357_v6 = vadd.f32 %v355_v3, %v750_v16 }
  0x53   : > { %v385_v7 = vsub.f32 %v356_v5, %v377_v1 }
  0x54   : > { %v386_v8 = vsub.f32 %v357_v6, %v384_v4 }
  0x55   : > { %v404_v9 = vsel %vm400_vm4, %v385_v7, 0.0 }
  0x56   : > { %v405_v10 = vsel %vm401_vm5, %v386_v8, 0.0  ;;  %vm417_vm7 = vcmp.gt.f32.partialorder %v404_v9, 0.3 }
  0x57   : > { %v408_v11 = vrot.slane %v405_v10, 7  ;;  %vm418_vm9 = vcmp.gt.f32.partialorder %v405_v10, 0.3  ;;  %v630_v13 = vsel %vm417_vm7, 1.0, %v696_v12  ;;  %v437_v19 = vsel %vm417_vm7, %v404_v9, 0.0 }
  0x58   : > { %v631_v14 = vsel %vm418_vm9, 1.0, %v696_v12  ;;  %v425_v15 = vsel %vm409_vm6, %v630_v13, 0.0  ;;  %v438_v20 = vsel %vm418_vm9, %v405_v10, 0.0  ;;  %v439_v21 = vsel %vm409_vm6, %v437_v19, 0.0 }
  0x59   : > { %v426_v16 = vsel %vm409_vm6, %v631_v14, 0.0  ;;  %v410_v17 = vsel %vm409_vm6, %v404_v9, %v408_v11  ;;  %v440_v23 = vsel %vm409_vm6, %v438_v20, 0.0 }
  0x5a   : > { %v427_v18 = vadd.f32 %v426_v16, %v425_v15  ;;  %416 = vst.msk [vmem:[%s287_s29] sm:$0x3] %vm414_vm8, %v410_v17  ;;  %v441_v22 = vadd.f32 %v440_v23, %v439_v21 }
  0x5c   : > { %428 = vadd.xlane.f32.xlu0 %v427_v18 }
  0x64   : > { %442 = vadd.xlane.f32.xlu0 %v441_v22 }
  0xcf   : > { %v429_v24 = vpop.xlane.xlu0 %428 }
  0xd0   : > { %v430_v25 = vrot.slane %v429_v24, 4 }
  0xd2   : > { %v431_v26 = vadd.f32 %v430_v25, %v429_v24 }
  0xd4   : > { %v432_v27 = vrot.slane %v431_v26, 2 }
  0xd6   : > { %v433_v28 = vadd.f32 %v432_v27, %v431_v26 }
  0xd7   : > { %v443_v29 = vpop.xlane.xlu0 %442 }
  0xd8   : > { %v444_v30 = vrot.slane %v443_v29, 4  ;;  %v434_v31 = vrot.slane %v433_v28, 1 }
  0xda   : > { %v445_v32 = vadd.f32 %v444_v30, %v443_v29  ;;  %v435_v33 = vadd.f32 %v434_v31, %v433_v28 }
  0xdc   : > { %v446_v34 = vrot.slane %v445_v32, 2  ;;  %635 = vpush %v435_v33 }
  0xde   : > { %v447_v35 = vadd.f32 %v446_v34, %v445_v32 }
  0xe0   : > { %v448_v36 = vrot.slane %v447_v35, 1 }
  0xe2   : > { %v449_v37 = vadd.f32 %v448_v36, %v447_v35 }
  0xe4   : > { %637 = vpush %v449_v37 }
 0x10d   : > { %s636_s7 = spop %635 }
 0x10e   : > { %v451_v38 = vstv %s636_s7 }
 0x10f   : > { %452 = vst [vmem:[%s294_s6] sm:$0x1] %v451_v38 }
 0x115   : > { %s638_s11 = spop %637 }
 0x116   : > { %v453_v39 = vstv %s638_s11 }
 0x117   : > { %454 = vst [vmem:[%s300_s10] sm:$0x1] %v453_v39 }
 0x118 PF: > { %s15_s17 = sadd.s32 1, %s693_s17   ;;  %s801_s15 = smov %s689_s16 }
 0x119   : > { %p12_p5 = scmp.ge.s32.totalorder %s15_s17, 4   ;;  %s802_s16 = smov %s804_s18 }
 0x11b   :  { %14 = sbr.rel (!%p12_p5) target bundleno = 2 (0x2), region = 85 }

</bundles_post_ra>
